<compile_context>
chip_gen: v7x
topology: tpu7x:2x2x1
jax: 0.10.0
libtpu: 0.0.40
codegen_flags: <defaults>
</compile_context>

<pallas_src>
import jax
import jax.numpy as jnp
from jax.experimental import pallas as pl
from jax.experimental.pallas import tpu as pltpu


# ---------------------------------------------------------------------------
# Model configuration (small, consistent with the module's constructor)
# ---------------------------------------------------------------------------
ENCODER_LAYER_SIZES = [32, 64]   # layer_sizes[0] is the x feature dim
LATENT_SIZE = 16
DECODER_LAYER_SIZES = [64, 32]   # last entry is the reconstruction dim
COND_SIZE = 8
BATCH = 2

X_DIM = ENCODER_LAYER_SIZES[0]
ENC_H = ENCODER_LAYER_SIZES[1]
DEC_H, RECON_DIM = DECODER_LAYER_SIZES
LANES = 128

ROW_ALIGN = 16          # bf16-safe sublane alignment for batch tiles
MAX_TB = 1024           # target batch-tile size (HBM-roofline sweet spot)

# ---- output slab lane layout (bf16[B, 128]) ----
O_RECON = 0                               # lanes [0, 32)
O_MEANS = 32                              # lanes [32, 48)
O_LOGVAR = 48                             # lanes [48, 64)
O_Z = 64                                  # lanes [64, 80)
OUT_USED = O_Z + LATENT_SIZE              # 80 real lanes

# ---- compact parameter slab layout (bf16[112, 128]) ----
# lanes [0:64)  rows [0:32)   : enc_w0 x-part   (32 -> 64)
# lanes [0:64)  rows [32:40)  : enc_w0 c-part   ( 8 -> 64)
# lanes [64:128) rows [0:16)  : dec_w0 z-part   (16 -> 64)
# lanes [64:128) rows [16:24) : dec_w0 c-part   ( 8 -> 64)
# lanes [0:32)  rows [40:104) : [W_means | W_logvar]  (64 -> 32)
# lanes [32:64) rows [40:104) : dec_w1           (64 -> 32)
# rows 104..107               : enc_b0 | [bm|bv] | dec_b0 | dec_b1
R_ENC_W0X = 0
R_ENC_W0C = 32
R_DEC_W0Z = 0
R_DEC_W0C = 16
R_HEADS = 40
R_B_ENC0 = 104
R_B_MV = 105
R_B_DEC0 = 106
R_B_DEC1 = 107
L_ENC = 0
L_DEC0 = 64
L_WMV = 0
L_DECW1 = 32
PAR_ROWS = 112
PARAM_DTYPE = jnp.bfloat16
OUT_DTYPE = jnp.bfloat16


def _round_up(n, m):
    return (n + m - 1) // m * m


def _cdiv(a, b):
    return (a + b - 1) // b


# ---------------------------------------------------------------------------
# Kernel
# ---------------------------------------------------------------------------
def cvae_kernel(x_ref, c_ref, eps_ref, par_ref, out_ref):
    f32 = jnp.float32
    cdt = jnp.bfloat16                       # MXU feed dtype

    x = x_ref[...].astype(cdt)               # (TB, 32)
    c = c_ref[...].astype(cdt)               # (TB, 8)
    eps = eps_ref[...]                       # (TB, 16) f32

    # ---- Encoder L0: relu(cat(x, c) @ W0 + b0) as two split dots ----
    w0x = par_ref[R_ENC_W0X:R_ENC_W0X + X_DIM, L_ENC:L_ENC + ENC_H]
    w0c = par_ref[R_ENC_W0C:R_ENC_W0C + COND_SIZE, L_ENC:L_ENC + ENC_H]
    b0 = par_ref[R_B_ENC0:R_B_ENC0 + 1, 0:ENC_H].astype(f32)
    h = (jnp.dot(x, w0x, preferred_element_type=f32)
         + jnp.dot(c, w0c, preferred_element_type=f32) + b0)
    h = jnp.maximum(h, 0.0).astype(cdt)

    # ---- means / log_var heads fused into one MXU pass ----
    wmv = par_ref[R_HEADS:R_HEADS + ENC_H, L_WMV:L_WMV + 2 * LATENT_SIZE]
    bmv = par_ref[R_B_MV:R_B_MV + 1, 0:2 * LATENT_SIZE].astype(f32)
    mv = jnp.dot(h, wmv, preferred_element_type=f32) + bmv     # (TB, 32)
    means = mv[:, 0:LATENT_SIZE]
    log_var = mv[:, LATENT_SIZE:2 * LATENT_SIZE]

    # ---- reparameterization: z = eps * exp(0.5 * log_var) + means (f32) ----
    std = jnp.exp(0.5 * log_var)
    z = eps * std + means

    # ---- Decoder L0: relu(cat(z, c) @ W0 + b0) as two split dots ----
    w0z = par_ref[R_DEC_W0Z:R_DEC_W0Z + LATENT_SIZE, L_DEC0:L_DEC0 + DEC_H]
    w0cd = par_ref[R_DEC_W0C:R_DEC_W0C + COND_SIZE, L_DEC0:L_DEC0 + DEC_H]
    bd0 = par_ref[R_B_DEC0:R_B_DEC0 + 1, 0:DEC_H].astype(f32)
    d = (jnp.dot(z.astype(cdt), w0z, preferred_element_type=f32)
         + jnp.dot(c, w0cd, preferred_element_type=f32) + bd0)
    d = jnp.maximum(d, 0.0).astype(cdt)

    # ---- Decoder L1 + sigmoid (exp -> EUP, approx reciprocal -> EUP) ----
    w1 = par_ref[R_HEADS:R_HEADS + DEC_H, L_DECW1:L_DECW1 + RECON_DIM]
    bd1 = par_ref[R_B_DEC1:R_B_DEC1 + 1, 0:RECON_DIM].astype(f32)
    logits = jnp.dot(d, w1, preferred_element_type=f32) + bd1
    recon = pl.reciprocal(1.0 + jnp.exp(-logits), approx=True)

    # ---- single unmasked 128-lane store of the packed output row ----
    pad = jnp.zeros((recon.shape[0], LANES - OUT_USED), f32)
    out_ref[...] = jnp.concatenate([recon, mv, z, pad], axis=-1).astype(
        out_ref.dtype)


# ---------------------------------------------------------------------------
# Parameters (PyTorch-style init; W stored as [in, out] so y = x @ W + b)
# ---------------------------------------------------------------------------
def _linear_params(key, in_size, out_size):
    kw, kb = jax.random.split(key)
    bound = 1.0 / jnp.sqrt(jnp.float32(in_size))
    w = jax.random.uniform(kw, (in_size, out_size), jnp.float32, -bound, bound)
    b = jax.random.uniform(kb, (1, out_size), jnp.float32, -bound, bound)
    return w, b


def make_params(key):
    keys = jax.random.split(key, 6)

    enc_w0, enc_b0 = _linear_params(keys[0], X_DIM + COND_SIZE, ENC_H)
    enc_w0x, enc_w0c = enc_w0[:X_DIM], enc_w0[X_DIM:]

    wm, bm = _linear_params(keys[1], ENC_H, LATENT_SIZE)
    wv, bv = _linear_params(keys[2], ENC_H, LATENT_SIZE)

    dec_w0, dec_b0 = _linear_params(keys[3], LATENT_SIZE + COND_SIZE, DEC_H)
    dec_w0z, dec_w0c = dec_w0[:LATENT_SIZE], dec_w0[LATENT_SIZE:]

    dec_w1, dec_b1 = _linear_params(keys[4], DEC_H, RECON_DIM)

    return (enc_w0x, enc_w0c, enc_b0, wm, bm, wv, bv,
            dec_w0z, dec_w0c, dec_b0, dec_w1, dec_b1)


def pack_params(params):
    """Pack all parameters into one compact bf16[PAR_ROWS, 128] slab."""
    (enc_w0x, enc_w0c, enc_b0, wm, bm, wv, bv,
     dec_w0z, dec_w0c, dec_b0, dec_w1, dec_b1) = params
    slab = jnp.zeros((PAR_ROWS, LANES), jnp.float32)
    slab = slab.at[R_ENC_W0X:R_ENC_W0X + X_DIM, L_ENC:L_ENC + ENC_H].set(enc_w0x)
    slab = slab.at[R_ENC_W0C:R_ENC_W0C + COND_SIZE, L_ENC:L_ENC + ENC_H].set(enc_w0c)
    slab = slab.at[R_DEC_W0Z:R_DEC_W0Z + LATENT_SIZE, L_DEC0:L_DEC0 + DEC_H].set(dec_w0z)
    slab = slab.at[R_DEC_W0C:R_DEC_W0C + COND_SIZE, L_DEC0:L_DEC0 + DEC_H].set(dec_w0c)
    wmv = jnp.concatenate([wm, wv], axis=1)                       # (64, 32)
    slab = slab.at[R_HEADS:R_HEADS + ENC_H, L_WMV:L_WMV + 2 * LATENT_SIZE].set(wmv)
    slab = slab.at[R_HEADS:R_HEADS + DEC_H, L_DECW1:L_DECW1 + RECON_DIM].set(dec_w1)
    slab = slab.at[R_B_ENC0, 0:ENC_H].set(enc_b0[0])
    slab = slab.at[R_B_MV, 0:2 * LATENT_SIZE].set(
        jnp.concatenate([bm[0], bv[0]], axis=0))
    slab = slab.at[R_B_DEC0, 0:DEC_H].set(dec_b0[0])
    slab = slab.at[R_B_DEC1, 0:RECON_DIM].set(dec_b1[0])
    return slab.astype(PARAM_DTYPE)


# ---------------------------------------------------------------------------
# Forward wrapper
# ---------------------------------------------------------------------------
@jax.jit
def cvae_forward(x, c, eps, param_slab):
    batch = x.shape[0]

    # Batch-aware tiling: tiles up to MAX_TB rows, padding bounded to <16 rows
    # per tile.  Tiles stay far below every generation's scoped-VMEM limit
    # (a 1024-row tile is <0.5 MiB of activations + a 28 KiB param slab).
    bp16 = _round_up(max(batch, 1), ROW_ALIGN)
    n_tiles = _cdiv(bp16, MAX_TB)
    tb = _round_up(_cdiv(bp16, n_tiles), ROW_ALIGN)
    bp = n_tiles * tb

    if bp != batch:
        pad = bp - batch
        x = jnp.pad(x, ((0, pad), (0, 0)))
        c = jnp.pad(c, ((0, pad), (0, 0)))
        eps = jnp.pad(eps, ((0, pad), (0, 0)))

    flops = 2 * bp * (X_DIM * ENC_H + COND_SIZE * ENC_H
                      + ENC_H * 2 * LATENT_SIZE
                      + LATENT_SIZE * DEC_H + COND_SIZE * DEC_H
                      + DEC_H * RECON_DIM)
    bytes_accessed = (4 * bp * (X_DIM + COND_SIZE + LATENT_SIZE)   # f32 inputs
                      + 2 * PAR_ROWS * LANES                        # bf16 params
                      + 2 * bp * LANES)                             # bf16 output
    cost = pl.CostEstimate(flops=flops,
                           transcendentals=bp * (LATENT_SIZE + 2 * RECON_DIM),
                           bytes_accessed=bytes_accessed)

    packed = pl.pallas_call(
        cvae_kernel,
        out_shape=jax.ShapeDtypeStruct((bp, LANES), OUT_DTYPE),
        grid_spec=pltpu.PrefetchScalarGridSpec(
            num_scalar_prefetch=0,
            grid=(n_tiles,),
            in_specs=[
                pl.BlockSpec((tb, X_DIM), lambda i: (i, 0)),        # x
                pl.BlockSpec((tb, COND_SIZE), lambda i: (i, 0)),    # c
                pl.BlockSpec((tb, LATENT_SIZE), lambda i: (i, 0)),  # eps
                pl.BlockSpec((PAR_ROWS, LANES), lambda i: (0, 0)),  # params (resident)
            ],
            out_specs=pl.BlockSpec((tb, LANES), lambda i: (i, 0)),
        ),
        compiler_params=pltpu.CompilerParams(
            dimension_semantics=("parallel",)),   # v7x: batch tiles across 2 TCs
        cost_estimate=cost,
    )(x, c, eps, param_slab)

    recon = packed[:batch, O_RECON:O_RECON + RECON_DIM].astype(jnp.float32)
    means = packed[:batch, O_MEANS:O_MEANS + LATENT_SIZE].astype(jnp.float32)
    log_var = packed[:batch, O_LOGVAR:O_LOGVAR + LATENT_SIZE].astype(jnp.float32)
    z = packed[:batch, O_Z:O_Z + LATENT_SIZE].astype(jnp.float32)
    return recon, means, log_var, z


# ---------------------------------------------------------------------------
# Pure-JAX reference mirroring the PyTorch module (f32)
# ---------------------------------------------------------------------------
def reference_forward(x, c, eps, params):
    (enc_w0x, enc_w0c, enc_b0, wm, bm, wv, bv,
     dec_w0z, dec_w0c, dec_b0, dec_w1, dec_b1) = params
    h = jnp.maximum(x @ enc_w0x + c @ enc_w0c + enc_b0, 0.0)
    means = h @ wm + bm
    log_var = h @ wv + bv
    z = eps * jnp.exp(0.5 * log_var) + means
    d = jnp.maximum(z @ dec_w0z + c @ dec_w0c + dec_b0, 0.0)
    logits = d @ dec_w1 + dec_b1
    recon = 1.0 / (1.0 + jnp.exp(-logits))
    return recon, means, log_var, z


if __name__ == "__main__":
    key = jax.random.PRNGKey(0)
    k_param, k_x, k_c, k_eps = jax.random.split(key, 4)

    params = make_params(k_param)
    param_slab = pack_params(params)
    x = jax.random.normal(k_x, (BATCH, X_DIM), jnp.float32)
    c = jax.random.normal(k_c, (BATCH, COND_SIZE), jnp.float32)
    eps = jax.random.normal(k_eps, (BATCH, LATENT_SIZE), jnp.float32)

    recon, means, log_var, z = cvae_forward(x, c, eps, param_slab)
    jax.block_until_ready((recon, means, log_var, z))

    # Sanity-check against pure-JAX f32 reference (kernel uses bf16 weights,
    # bf16 MXU inputs, bf16 output slab and approx reciprocal -> loose tol).
    r_ref, m_ref, lv_ref, z_ref = reference_forward(x, c, eps, params)
    assert jnp.allclose(recon, r_ref, atol=3e-2, rtol=3e-2), "recon mismatch"
    assert jnp.allclose(means, m_ref, atol=3e-2, rtol=3e-2), "means mismatch"
    assert jnp.allclose(log_var, lv_ref, atol=3e-2, rtol=3e-2), "log_var mismatch"
    assert jnp.allclose(z, z_ref, atol=3e-2, rtol=3e-2), "z mismatch"

    print("KERNEL_OK")
</pallas_src>

<mosaic_0001>
module attributes {stable_mosaic.version = 11 : i64} {
  func.func @cvae_kernel(%arg0: i32, %arg1: memref<16x32xf32, #tpu.memory_space<vmem>>, %arg2: memref<16x8xf32, #tpu.memory_space<vmem>>, %arg3: memref<16x16xf32, #tpu.memory_space<vmem>>, %arg4: memref<112x128xbf16, #tpu.memory_space<vmem>>, %arg5: memref<16x128xbf16, #tpu.memory_space<vmem>>) attributes {dimension_semantics = [#tpu.dimension_semantics<parallel>], iteration_bounds = array<i64: 1>, scalar_prefetch = 0 : i64, scratch_operands = 0 : i64, tpu.core_type = #tpu.core_type<tc>, window_params = [{transform_indices = @transform_0, window_bounds = array<i64: 16, 32>}, {transform_indices = @transform_1, window_bounds = array<i64: 16, 8>}, {transform_indices = @transform_2, window_bounds = array<i64: 16, 16>}, {pipeline_mode = #tpu.pipeline_mode<synchronous>, transform_indices = @transform_3, window_bounds = array<i64: 112, 128>}, {transform_indices = @transform_4, window_bounds = array<i64: 16, 128>}]} {
    %c0 = arith.constant 0 : index
    %c0_0 = arith.constant 0 : index
    %0 = vector.load %arg1[%c0, %c0_0] : memref<16x32xf32, #tpu.memory_space<vmem>>, vector<16x32xf32>
    %1 = arith.truncf %0 : vector<16x32xf32> to vector<16x32xbf16>
    %c0_1 = arith.constant 0 : index
    %c0_2 = arith.constant 0 : index
    %2 = vector.load %arg2[%c0_1, %c0_2] : memref<16x8xf32, #tpu.memory_space<vmem>>, vector<16x8xf32>
    %3 = arith.truncf %2 : vector<16x8xf32> to vector<16x8xbf16>
    %c0_3 = arith.constant 0 : index
    %c0_4 = arith.constant 0 : index
    %4 = vector.load %arg3[%c0_3, %c0_4] : memref<16x16xf32, #tpu.memory_space<vmem>>, vector<16x16xf32>
    %c0_5 = arith.constant 0 : index
    %c0_6 = arith.constant 0 : index
    %5 = vector.load %arg4[%c0_5, %c0_6] : memref<112x128xbf16, #tpu.memory_space<vmem>>, vector<32x64xbf16>
    %c32 = arith.constant 32 : index
    %c0_7 = arith.constant 0 : index
    %6 = vector.load %arg4[%c32, %c0_7] : memref<112x128xbf16, #tpu.memory_space<vmem>>, vector<8x64xbf16>
    %c104 = arith.constant 104 : index
    %c0_8 = arith.constant 0 : index
    %7 = vector.load %arg4[%c104, %c0_8] : memref<112x128xbf16, #tpu.memory_space<vmem>>, vector<1x64xbf16>
    %8 = arith.extf %7 : vector<1x64xbf16> to vector<1x64xf32>
    %cst = arith.constant dense<0.000000e+00> : vector<16x64xf32>
    %9 = tpu.matmul %1, %5, %cst {dimension_numbers = #tpu.dot_dimension_numbers<[1], [0], [0], [1], [0, 0, 1, 1], [], []>} : vector<16x32xbf16>, vector<32x64xbf16>, vector<16x64xf32> -> vector<16x64xf32>
    %cst_9 = arith.constant dense<0.000000e+00> : vector<16x64xf32>
    %10 = tpu.matmul %3, %6, %cst_9 {dimension_numbers = #tpu.dot_dimension_numbers<[1], [0], [0], [1], [0, 0, 1, 1], [], []>} : vector<16x8xbf16>, vector<8x64xbf16>, vector<16x64xf32> -> vector<16x64xf32>
    %11 = arith.addf %9, %10 : vector<16x64xf32>
    %12 = vector.broadcast %8 : vector<1x64xf32> to vector<16x64xf32>
    %13 = arith.addf %11, %12 : vector<16x64xf32>
    %cst_10 = arith.constant 0.000000e+00 : f32
    %14 = vector.broadcast %cst_10 : f32 to vector<16x64xf32>
    %15 = arith.maximumf %13, %14 : vector<16x64xf32>
    %16 = arith.truncf %15 : vector<16x64xf32> to vector<16x64xbf16>
    %c40 = arith.constant 40 : index
    %c0_11 = arith.constant 0 : index
    %17 = vector.load %arg4[%c40, %c0_11] : memref<112x128xbf16, #tpu.memory_space<vmem>>, vector<64x32xbf16>
    %c105 = arith.constant 105 : index
    %c0_12 = arith.constant 0 : index
    %18 = vector.load %arg4[%c105, %c0_12] : memref<112x128xbf16, #tpu.memory_space<vmem>>, vector<1x32xbf16>
    %19 = arith.extf %18 : vector<1x32xbf16> to vector<1x32xf32>
    %cst_13 = arith.constant dense<0.000000e+00> : vector<16x32xf32>
    %20 = tpu.matmul %16, %17, %cst_13 {dimension_numbers = #tpu.dot_dimension_numbers<[1], [0], [0], [1], [0, 0, 1, 1], [], []>} : vector<16x64xbf16>, vector<64x32xbf16>, vector<16x32xf32> -> vector<16x32xf32>
    %21 = vector.broadcast %19 : vector<1x32xf32> to vector<16x32xf32>
    %22 = arith.addf %20, %21 : vector<16x32xf32>
    %23 = vector.extract_strided_slice %22 {offsets = [0, 0], sizes = [16, 16], strides = [1, 1]} : vector<16x32xf32> to vector<16x16xf32>
    %24 = vector.extract_strided_slice %22 {offsets = [0, 16], sizes = [16, 16], strides = [1, 1]} : vector<16x32xf32> to vector<16x16xf32>
    %cst_14 = arith.constant 5.000000e-01 : f32
    %25 = vector.broadcast %cst_14 : f32 to vector<16x16xf32>
    %26 = arith.mulf %25, %24 : vector<16x16xf32>
    %27 = math.exp %26 : vector<16x16xf32>
    %28 = arith.mulf %4, %27 : vector<16x16xf32>
    %29 = arith.addf %28, %23 : vector<16x16xf32>
    %c0_15 = arith.constant 0 : index
    %c64 = arith.constant 64 : index
    %30 = vector.load %arg4[%c0_15, %c64] : memref<112x128xbf16, #tpu.memory_space<vmem>>, vector<16x64xbf16>
    %c16 = arith.constant 16 : index
    %c64_16 = arith.constant 64 : index
    %31 = vector.load %arg4[%c16, %c64_16] : memref<112x128xbf16, #tpu.memory_space<vmem>>, vector<8x64xbf16>
    %c106 = arith.constant 106 : index
    %c0_17 = arith.constant 0 : index
    %32 = vector.load %arg4[%c106, %c0_17] : memref<112x128xbf16, #tpu.memory_space<vmem>>, vector<1x64xbf16>
    %33 = arith.extf %32 : vector<1x64xbf16> to vector<1x64xf32>
    %34 = arith.truncf %29 : vector<16x16xf32> to vector<16x16xbf16>
    %cst_18 = arith.constant dense<0.000000e+00> : vector<16x64xf32>
    %35 = tpu.matmul %34, %30, %cst_18 {dimension_numbers = #tpu.dot_dimension_numbers<[1], [0], [0], [1], [0, 0, 1, 1], [], []>} : vector<16x16xbf16>, vector<16x64xbf16>, vector<16x64xf32> -> vector<16x64xf32>
    %cst_19 = arith.constant dense<0.000000e+00> : vector<16x64xf32>
    %36 = tpu.matmul %3, %31, %cst_19 {dimension_numbers = #tpu.dot_dimension_numbers<[1], [0], [0], [1], [0, 0, 1, 1], [], []>} : vector<16x8xbf16>, vector<8x64xbf16>, vector<16x64xf32> -> vector<16x64xf32>
    %37 = arith.addf %35, %36 : vector<16x64xf32>
    %38 = vector.broadcast %33 : vector<1x64xf32> to vector<16x64xf32>
    %39 = arith.addf %37, %38 : vector<16x64xf32>
    %cst_20 = arith.constant 0.000000e+00 : f32
    %40 = vector.broadcast %cst_20 : f32 to vector<16x64xf32>
    %41 = arith.maximumf %39, %40 : vector<16x64xf32>
    %42 = arith.truncf %41 : vector<16x64xf32> to vector<16x64xbf16>
    %c40_21 = arith.constant 40 : index
    %c32_22 = arith.constant 32 : index
    %43 = vector.load %arg4[%c40_21, %c32_22] : memref<112x128xbf16, #tpu.memory_space<vmem>>, vector<64x32xbf16>
    %c107 = arith.constant 107 : index
    %c0_23 = arith.constant 0 : index
    %44 = vector.load %arg4[%c107, %c0_23] : memref<112x128xbf16, #tpu.memory_space<vmem>>, vector<1x32xbf16>
    %45 = arith.extf %44 : vector<1x32xbf16> to vector<1x32xf32>
    %cst_24 = arith.constant dense<0.000000e+00> : vector<16x32xf32>
    %46 = tpu.matmul %42, %43, %cst_24 {dimension_numbers = #tpu.dot_dimension_numbers<[1], [0], [0], [1], [0, 0, 1, 1], [], []>} : vector<16x64xbf16>, vector<64x32xbf16>, vector<16x32xf32> -> vector<16x32xf32>
    %47 = vector.broadcast %45 : vector<1x32xf32> to vector<16x32xf32>
    %48 = arith.addf %46, %47 : vector<16x32xf32>
    %cst_25 = arith.constant 0.000000e+00 : f32
    %49 = vector.broadcast %cst_25 : f32 to vector<16x32xf32>
    %50 = arith.subf %49, %48 : vector<16x32xf32>
    %51 = math.exp %50 : vector<16x32xf32>
    %cst_26 = arith.constant 1.000000e+00 : f32
    %52 = vector.broadcast %cst_26 : f32 to vector<16x32xf32>
    %53 = arith.addf %52, %51 : vector<16x32xf32>
    %54 = tpu.reciprocal %53 {approx = true} : vector<16x32xf32> -> vector<16x32xf32>
    %cst_27 = arith.constant 0.000000e+00 : f32
    %55 = vector.broadcast %cst_27 : f32 to vector<16x48xf32>
    %56 = tpu.concatenate %54, %22, %29, %55 in 1 : vector<16x32xf32>, vector<16x32xf32>, vector<16x16xf32>, vector<16x48xf32> -> vector<16x128xf32>
    %57 = arith.truncf %56 : vector<16x128xf32> to vector<16x128xbf16>
    %c0_28 = arith.constant 0 : index
    %c0_29 = arith.constant 0 : index
    %58 = vector.load %arg5[%c0_28, %c0_29] : memref<16x128xbf16, #tpu.memory_space<vmem>>, vector<16x128xbf16>
    tpu.vector_store %arg5[%c0_28, %c0_29], %57 {strides = array<i32>} : memref<16x128xbf16, #tpu.memory_space<vmem>>, vector<16x128xbf16>,
    return
  }
  func.func @transform_0(%arg0: i32) -> (i32, i32) {
    %c0_i32 = arith.constant 0 : i32
    %c0_i32_0 = arith.constant 0 : i32
    return %arg0, %c0_i32 : i32, i32
  }
  func.func @transform_1(%arg0: i32) -> (i32, i32) {
    %c0_i32 = arith.constant 0 : i32
    %c0_i32_0 = arith.constant 0 : i32
    return %arg0, %c0_i32 : i32, i32
  }
  func.func @transform_2(%arg0: i32) -> (i32, i32) {
    %c0_i32 = arith.constant 0 : i32
    %c0_i32_0 = arith.constant 0 : i32
    return %arg0, %c0_i32 : i32, i32
  }
  func.func @transform_3(%arg0: i32) -> (i32, i32) {
    %c0_i32 = arith.constant 0 : i32
    %c0_i32_0 = arith.constant 0 : i32
    %c0_i32_1 = arith.constant 0 : i32
    return %c0_i32, %c0_i32_0 : i32, i32
  }
  func.func @transform_4(%arg0: i32) -> (i32, i32) {
    %c0_i32 = arith.constant 0 : i32
    %c0_i32_0 = arith.constant 0 : i32
    return %arg0, %c0_i32 : i32, i32
  }
}

</mosaic_0001>

<bundles_post_ra>
// kernel: cvae_forward.1
= control target key start
LH: loop header
LB: loop body
LE: loop exit
PB: predicated region body
PF: predicated region fallthrough
CT: control target
= control target key end

     0   :  { %vm37_vm0 = vcmask 1043456   ;;  %v599_v0 = vmov 0.0   ;;  %vm600_vm1 = vmmov 0   ;;  %vm33_vm2 = vcmask 64512   ;;  %s601_s13 = smov 64   ;;  %s602_s14 = smov 112   ;;  %s745_s3 = inlined_call_operand.vmem [shape: bf16[112,128], index: 3, kind: input, shape index: {}]   ;;  %s746_s1 = inlined_call_operand.vmem [shape: f32[16,8], index: 1, kind: input, shape index: {}]   ;;  %s747_s0 = inlined_call_operand.vmem [shape: f32[16,32], index: 0, kind: input, shape index: {}]   ;;  %s748_s2 = inlined_call_operand.vmem [shape: f32[16,16], index: 2, kind: input, shape index: {}]   ;;  %s749_s4 = inlined_call_operand.vmem [shape: bf16[16,128], index: 4, kind: output, shape index: {}]  }
   0x1   :  { %513 = vmatprep.subr.bf16.mxu1 %v599_v0  ;;  %v30_v1 = vld [vmem:[%s745_s3 + $0x10] sm:$0xf]  ;;  %515 = vmatprep.mubr.msk.bf16.mxu1 %vm600_vm1, %v599_v0  ;;  %v21_v2 = vld [vmem:[%s746_s1] sm:$0xff]  ;;  %v22_v3 = vld [vmem:[%s746_s1 + $0x8] sm:$0xff]  ;;  %vm94_vm3 = vcmask 261120   ;;  %v139_v15 = vlaneseq  ;;  %vm184_vm4 = vcmask 523264  }
   0x2   :  { %v39_v4 = vsel %vm37_vm0, %v30_v1, 0  ;;  %v643_v5 = vpack.c.bf16 %v22_v3, %v21_v2  ;;  %527 = vmatprep.subr.bf16.mxu0 %v599_v0  ;;  %535 = vmatprep.mubr.msk.bf16.mxu0 %vm600_vm1, %v599_v0  ;;  %v579_v6 = vld [vmem:[%s745_s3] sm:$0xff]   ;;  %v580_v7 = vld [vmem:[%s745_s3 + $0x8] sm:$0xff]   ;;  %v673_v11 = vld [vmem:[%s745_s3 + $0x14] sm:$0xff]   ;;  %s603_s17 = smov 96   ;;  %s604_s18 = smov 32  }
   0x3   :  { %514 = vmatpush3.bf16.msra.mxu1 %v39_v4  ;;  %v18_v8 = vld [vmem:[%s747_s0] sm:$0xff]  ;;  %v19_v9 = vld [vmem:[%s747_s0 + $0x8] sm:$0xff]  ;;  %528 = vmatpush3.bf16.msra.mxu0 %v673_v11  ;;  %v695_v16 = vshrl.u32 %v139_v15, 7  ;;  %v31_v18 = vld [vmem:[%s745_s3 + $0x34] sm:$0x1]  ;;  %vm310_vm5 = vcmask 130048  }
   0x4   :  { %519 = vmatprep.subr.bf16.mxu1 %v599_v0  ;;  %v20_v10 = vpack.c.bf16 %v19_v9, %v18_v8  ;;  %529 = vmatprep.subr.bf16.mxu0 %v599_v0  ;;  %v680_v12 = vld [vmem:[%s745_s3 + $0x1c] sm:$0xff]   ;;  %v583_v13 = vld [vmem:[%s745_s3 + $0x24] sm:$0xff]   ;;  %v691_v14 = vld [vmem:[%s745_s3 + $0x2c] sm:$0xff]   ;;  %v32_v22 = vunpack.c.l.bf16 %v31_v18  ;;  %vm454_vm6 = vcmask 654336  }
   0x5   :  { %v141_v23 = vsub.s32 0, %v695_v16  ;;  %v585_v36 = vld [vmem:[%s745_s3 + $0x8] ss:$0 sps:$4 sm:$0xff]   ;;  %v158_v37 = vsub.s32 1, %v695_v16  ;;  %v586_v53 = vld [vmem:[%s745_s3] sm:$0xff]  }
   0x6   :  { %516 = vmatmul.mubr.msk.bf16.vlgmr.msra.gmra.mrb[0].mxu1 %vm33_vm2, %v643_v5  ;;  %256 = vrot.lane.b32.xlu0 %v585_v36, %s601_s13  ;;  %v24_v55 = vld [vmem:[%s748_s2] sm:$0xff]  ;;  %v25_v57 = vld [vmem:[%s748_s2 + $0x8] sm:$0xff] }
   0x7   :  { %520 = vmatpush3.bf16.msra.mxu1 %v579_v6  ;;  %523 = vmatprep.mubr.msk.bf16.mxu1 %vm600_vm1, %v599_v0  ;;  %v142_v24 = vrot.slane %v32_v22, %v141_v23  ;;  %v159_v38 = vrot.slane %v32_v22, %v158_v37 }
   0x8   :  { %521 = vmatprep.subr.bf16.mxu1 %v599_v0  ;;  %530 = vmatpush3.bf16.msra.mxu0 %v680_v12 }
   0x9   :  { %531 = vmatprep.subr.bf16.mxu0 %v599_v0 }
   0xb   :  { %522 = vmatpush3.bf16.msra.mxu1 %v580_v7 }
   0xc   :  { %539 = vmatprep.subr.bf16.mxu1 %v599_v0  ;;  %532 = vmatpush3.bf16.msra.mxu0 %v583_v13 }
   0xd   :  { %533 = vmatprep.subr.bf16.mxu0 %v599_v0 }
   0xe   :  { %524 = vmatmul.mubr.msk.bf16.vlgmr.msra.gmra.mrb[4].mxu1 %vm94_vm3, %v20_v10 }
   0xf   :  { %541 = vmatprep.mubr.msk.bf16.mxu1 %vm600_vm1, %v599_v0 }
  0x10   :  { %534 = vmatpush3.bf16.msra.mxu0 %v691_v14 }
  0x11   :  { %551 = vmatprep.subr.bf16.mxu0 %v599_v0 }
  0x78   :  { %v257_v39 = vpop.permute.xlu0 %256 }
  0x79   :  { %v259_v40 = vsel %vm37_vm0, %v257_v39, 0 }
  0x7a   :  { %540 = vmatpush3.bf16.msra.mxu1 %v259_v40 }
  0x7b   :  { %545 = vmatprep.subr.bf16.mxu1 %v599_v0 }
  0x7d   :  { %542 = vmatmul.mubr.msk.bf16.vlgmr.msra.gmra.mrb[8].mxu1 %vm33_vm2, %v643_v5 }
  0x7e   :  { %547 = vmatprep.mubr.msk.bf16.mxu1 %vm600_vm1, %v599_v0 }
  0xd9   :  { %v75_v17 = vpop.f32.mrb[0].mxu1 }
  0xda   :  { %v517_v19 = vpop.f32.mrb[1].mxu1 }
  0xdb   :  { %v78_v20 = vpop.f32.mrb[2].mxu1 }
  0xdc   :  { %v518_v21 = vpop.f32.mrb[3].mxu1 }
  0xe1   :  { %v132_v25 = vpop.f32.mrb[4].mxu1 }
  0xe2   :  { %v133_v26 = vadd.f32 %v132_v25, %v75_v17  ;;  %v525_v27 = vpop.f32.mrb[5].mxu1 }
  0xe3   :  { %v135_v28 = vpop.f32.mrb[6].mxu1 }
  0xe4   :  { %v143_v29 = vadd.f32 %v142_v24, %v133_v26  ;;  %v136_v30 = vadd.f32 %v135_v28, %v78_v20  ;;  %v526_v31 = vpop.f32.mrb[7].mxu1  ;;  %v366_v26 = vsub.s32 3, %v695_v16 }
  0xe6   :  { %v144_v32 = vadd.f32 %v142_v24, %v136_v30  ;;  %v145_v33 = vmax.f32 %v143_v29, 0.0 }
  0xe8   :  { %v146_v34 = vmax.f32 %v144_v32, 0.0 }
  0xea   :  { %v147_v35 = vpack.c.bf16 %v146_v34, %v145_v33 }
  0xec   :  { %536 = vmatmul.mubr.msk.bf16.vlgmr.msra.gmra.mrb[0].mxu0 %vm184_vm4, %v147_v35 }
  0xed   :  { %559 = vmatprep.mubr.msk.bf16.mxu0 %vm600_vm1, %v599_v0 }
 0x150   :  { %v295_v7 = vpop.f32.mrb[8].mxu1 }
 0x151   :  { %v543_v8 = vpop.f32.mrb[9].mxu1 }
 0x152   :  { %v298_v9 = vpop.f32.mrb[10].mxu1 }
 0x153   :  { %v544_v10 = vpop.f32.mrb[11].mxu1 }
 0x1bf   :  { %v222_v41 = vpop.f32.mrb[0].mxu0 }
 0x1c0   :  { %v223_v42 = vadd.f32 %v222_v41, %v159_v38  ;;  %v537_v43 = vpop.f32.mrb[1].mxu0 }
 0x1c1   :  { %v225_v44 = vpop.f32.mrb[2].mxu0 }
 0x1c2   :  { %v229_v45 = vmul.f32 0.5, %v223_v42  ;;  %v226_v46 = vadd.f32 %v225_v44, %v159_v38  ;;  %v538_v47 = vpop.f32.mrb[3].mxu0 }
 0x1c4   :  { %v231_v48 = vmul.f32 1.442695, %v229_v45  ;;  %v230_v49 = vmul.f32 0.5, %v226_v46  ;;  %v569_v54 = vpack.i.bf16 %v226_v46, %v223_v42 }
 0x1c6   :  { %587 = vpow2.f32 %v231_v48  ;;  %v233_v50 = vmul.f32 1.442695, %v230_v49 }
 0x1c8   :  { %589 = vpow2.f32 %v233_v50 }
 0x1d0   :  { %v588_v51 = vpop.eup %587 }
 0x1d1   :  { %237 = vrot.lane.b32.xlu0 %v588_v51, %s602_s14 }
 0x1d2   :  { %v590_v52 = vpop.eup %589 }
 0x1d3   :  { %239 = vrot.lane.b32.xlu1 %v590_v52, %s602_s14 }
 0x1d5   :  { %368 = vrot.lane.b32.xlu0 %v673_v11, %s603_s17  ;;  %v250_v11 = vld [vmem:[%s745_s3 + $0x34] sm:$0x2] }
 0x1d7   :  { %307 = vrot.lane.b32.xlu1 %v586_v53, %s601_s13 }
 0x1d9   :  { %372 = vrot.lane.b32.xlu0 %v583_v13, %s603_s17  ;;  %v357_v13 = vsub.s32 2, %v695_v16 }
 0x1db   :  { %370 = vrot.lane.b32.xlu1 %v680_v12, %s603_s17  ;;  %v251_v12 = vunpack.c.l.bf16 %v250_v11 }
 0x1dd   :  { %570 = vrot.lane.b32.xlu0 %v569_v54, %s604_s18  ;;  %v367_v27 = vrot.slane %v251_v12, %v366_v26 }
 0x1df   :  { %374 = vrot.lane.b32.xlu1 %v691_v14, %s603_s17  ;;  %v358_v14 = vrot.slane %v251_v12, %v357_v13 }
 0x243   :  { %v238_v56 = vpop.permute.xlu0 %237 }
 0x244   :  { %v243_v58 = vmul.f32 %v238_v56, %v24_v55 }
 0x245   :  { %v240_v59 = vpop.permute.xlu1 %239 }
 0x246   :  { %v244_v60 = vmul.f32 %v240_v59, %v25_v57  ;;  %v245_v62 = vadd.f32 %v243_v58, %v223_v42 }
 0x247   :  { %v369_v61 = vpop.permute.xlu0 %368 }
 0x248   :  { %v246_v63 = vadd.f32 %v244_v60, %v226_v46  ;;  %552 = vmatpush3.bf16.msra.mxu0 %v369_v61 }
 0x249   :  { %v308_v1 = vpop.permute.xlu1 %307  ;;  %553 = vmatprep.subr.bf16.mxu0 %v599_v0 }
 0x24a   :  { %v252_v2 = vpack.c.bf16 %v246_v63, %v245_v62  ;;  %546 = vmatpush3.bf16.msra.mxu1 %v308_v1  ;;  %v574_v3 = vpack.i.bf16 %v246_v63, %v245_v62 }
 0x24b   :  { %v373_v5 = vpop.permute.xlu0 %372 }
 0x24c   :  { %575 = vrot.lane.b32.xlu1 %v574_v3, %s601_s13 }
 0x24d   :  { %548 = vmatmul.mubr.msk.bf16.vlgmr.msra.gmra.mrb[12].mxu1 %vm310_vm5, %v252_v2  ;;  %v371_v4 = vpop.permute.xlu1 %370 }
 0x24e   :  { %554 = vmatpush3.bf16.msra.mxu0 %v371_v4 }
 0x24f   :  { %555 = vmatprep.subr.bf16.mxu0 %v599_v0  ;;  %v571_v16 = vpop.permute.xlu0 %570 }
 0x250   :  { %v572_v43 = vunpack.i.l.bf16 %v571_v16  ;;  %v573_v46 = vunpack.i.h.bf16 %v571_v16 }
 0x251   :  { %v375_v6 = vpop.permute.xlu1 %374 }
 0x252   :  { %556 = vmatpush3.bf16.msra.mxu0 %v373_v5 }
 0x253   :  { %557 = vmatprep.subr.bf16.mxu0 %v599_v0 }
 0x256   :  { %558 = vmatpush3.bf16.msra.mxu0 %v375_v6 }
 0x2be   :  { %v576_v42 = vpop.permute.xlu1 %575 }
 0x2bf   :  { %v577_v45 = vunpack.i.l.bf16 %v576_v42  ;;  %v578_v49 = vunpack.i.h.bf16 %v576_v42 }
 0x320   :  { %v348_v15 = vpop.f32.mrb[12].mxu1 }
 0x321   :  { %v349_v17 = vadd.f32 %v348_v15, %v295_v7  ;;  %v549_v18 = vpop.f32.mrb[13].mxu1 }
 0x322   :  { %v351_v19 = vpop.f32.mrb[14].mxu1 }
 0x323   :  { %v359_v20 = vadd.f32 %v358_v14, %v349_v17  ;;  %v352_v0 = vadd.f32 %v351_v19, %v298_v9  ;;  %v550_v21 = vpop.f32.mrb[15].mxu1 }
 0x325   :  { %v360_v22 = vadd.f32 %v358_v14, %v352_v0  ;;  %v361_v23 = vmax.f32 %v359_v20, 0.0 }
 0x327   :  { %v362_v24 = vmax.f32 %v360_v22, 0.0 }
 0x329   :  { %v363_v25 = vpack.c.bf16 %v362_v24, %v361_v23 }
 0x32b   :  { %560 = vmatmul.mubr.msk.bf16.vlgmr.msra.gmra.mrb[4].mxu0 %vm184_vm4, %v363_v25 }
 0x3fe   :  { %v417_v28 = vpop.f32.mrb[4].mxu0 }
 0x3ff   :  { %v418_v29 = vadd.f32 %v417_v28, %v367_v27  ;;  %v561_v30 = vpop.f32.mrb[5].mxu0 }
 0x400   :  { %v420_v31 = vpop.f32.mrb[6].mxu0 }
 0x401   :  { %v424_v32 = vsub.f32 0.0, %v418_v29  ;;  %v421_v33 = vadd.f32 %v420_v31, %v367_v27  ;;  %v562_v34 = vpop.f32.mrb[7].mxu0 }
 0x403   :  { %v426_v35 = vmul.f32 1.442695, %v424_v32  ;;  %v425_v36 = vsub.f32 0.0, %v421_v33 }
 0x405   :  { %591 = vpow2.f32 %v426_v35  ;;  %v428_v37 = vmul.f32 1.442695, %v425_v36 }
 0x407   :  { %593 = vpow2.f32 %v428_v37 }
 0x40f   :  { %v592_v38 = vpop.eup %591 }
 0x410   :  { %v430_v39 = vadd.f32 1.0, %v592_v38 }
 0x411   :  { %v594_v40 = vpop.eup %593 }
 0x412   :  { %595 = vrcp.f32 %v430_v39  ;;  %v431_v41 = vadd.f32 1.0, %v594_v40 }
 0x414   :  { %597 = vrcp.f32 %v431_v41 }
 0x41c   :  { %v596_v44 = vpop.eup %595 }
 0x41d   :  { %v450_v47 = vsel %vm94_vm3, %v596_v44, %v572_v43 }
 0x41e   :  { %v598_v48 = vpop.eup %597  ;;  %v452_v50 = vsel %vm184_vm4, %v450_v47, %v577_v45 }
 0x41f   :  { %v451_v51 = vsel %vm94_vm3, %v598_v48, %v573_v46  ;;  %v455_v53 = vsel %vm454_vm6, %v452_v50, 0.0 }
 0x420   :  { %v453_v52 = vsel %vm184_vm4, %v451_v51, %v578_v49 }
 0x421   :  { %v456_v54 = vsel %vm454_vm6, %v453_v52, 0.0 }
 0x422   :  { %v492_v55 = vpack.c.bf16 %v456_v54, %v455_v53 }
 0x424   :  { %493 = vst [vmem:[%s749_s4] sm:$0xff] %v492_v55  }

</bundles_post_ra>
